<compile_context>
chip_gen: v6e
topology: v6e:2x2x1
jax: 0.10.0
libtpu: 0.0.40
codegen_flags: <defaults>
</compile_context>

<pallas_src>
import functools

import jax
import jax.numpy as jnp
from jax.experimental import pallas as pl
from jax.experimental.pallas import tpu as pltpu


def _attn_kernel(x_ref, wqkv_ref, o_ref, *, block_b, seq_len, dpad):
    # x_ref:    (block_b*seq_len, Din)   activations, native dtype
    # wqkv_ref: (Din, 3*dpad)            packed, lane-padded [Wq*scale | Wk | Wv]
    # o_ref:    (block_b*seq_len, dpad)  lane-dense output slab
    x = x_ref[...]            # no f32 up-cast: native dtype straight into the MXU
    wqkv = wqkv_ref[...]

    # Fused Q/K/V projection: one tall MXU matmul, f32 accumulation.
    qkv = jnp.dot(x, wqkv, preferred_element_type=jnp.float32)       # (rows, 3*dpad)
    qkv = qkv.reshape(block_b, seq_len, 3 * dpad)

    # 128-lane tile-aligned slices (padding added in the wrapper).
    q = qkv[:, :, 0:dpad]                 # already scaled by 1/sqrt(dk) via Wq
    k = qkv[:, :, dpad:2 * dpad]
    v = qkv[:, :, 2 * dpad:3 * dpad]

    # Batched q @ k^T: (block_b, T, T). No cross-batch waste, no explicit transpose.
    scores = jnp.einsum("bqd,bkd->bqk", q, k, preferred_element_type=jnp.float32)

    # Causal mask: single (T, T) compare, broadcast over the batch dim.
    r = jax.lax.broadcasted_iota(jnp.int32, (seq_len, seq_len), 0)
    c = jax.lax.broadcasted_iota(jnp.int32, (seq_len, seq_len), 1)
    scores = jnp.where((c <= r)[None], scores, jnp.float32(-1e30))   # finite -> no NaN risk

    # Numerically-stable softmax; denominator reciprocal on the EUP (approx, ~2^-12 rel err).
    m = jnp.max(scores, axis=-1, keepdims=True)
    p = jnp.exp(scores - m)
    denom = jnp.sum(p, axis=-1, keepdims=True)
    weights = p * pl.reciprocal(denom, approx=True)

    # Dropout(p=0.1) is identity in eval mode.
    pv_dtype = x_ref.dtype    # probabilities in activation dtype for the P.V MXU matmul
    out = jnp.einsum("bqk,bkd->bqd",
                     weights.astype(pv_dtype), v.astype(pv_dtype),
                     preferred_element_type=jnp.float32)             # (block_b, T, dpad)
    o_ref[...] = out.reshape(block_b * seq_len, dpad).astype(o_ref.dtype)


def self_attention(x, wq, wk, wv, *, max_rows_per_block=512):
    """Causal self-attention. x: (B, T, Din); wq/wk/wv: (Din, Dout). Returns (B, T, Dout)."""
    B, T, Din = x.shape
    Dout = wq.shape[1]

    # Lane-dense padding: each head projection padded to a multiple of 128 lanes so the
    # in-kernel slices are tile-aligned and the output store is a full, unmasked vst.
    dpad = pl.cdiv(Dout, 128) * 128
    pad_cols = dpad - Dout

    def _pad(w):
        return jnp.pad(w, ((0, 0), (0, pad_cols))) if pad_cols else w

    # Fold 1/sqrt(dk) into the Wq columns once (amortized over every grid step).
    scale = jnp.asarray(1.0 / (float(Dout) ** 0.5), wq.dtype)
    wqkv = jnp.concatenate([_pad(wq * scale), _pad(wk), _pad(wv)], axis=1)  # (Din, 3*dpad)

    # Rows-per-step: batches folded into the sublane/M dim.
    #  - cap by max_rows_per_block (VMEM budget, sized for v7x's 64 MiB / 32 MiB scoped)
    #  - when B >= 2, force >= 2 grid steps so both v7x TensorCores get work
    #  - keep the row tile sublane-aligned (multiple of 8) unless it covers the whole array
    target = max(1, min(B, max_rows_per_block // max(T, 1)))
    if B >= 2:
        target = min(target, B // 2)
    block_b = B
    for d in range(target, 0, -1):
        if B % d == 0 and ((d * T) % 8 == 0 or d == B):
            block_b = d
            break
    num_blocks = B // block_b
    rows = block_b * T

    x2d = x.reshape(B * T, Din)
    kernel = functools.partial(_attn_kernel, block_b=block_b, seq_len=T, dpad=dpad)

    out2d = pl.pallas_call(
        kernel,
        out_shape=jax.ShapeDtypeStruct((B * T, dpad), x.dtype),
        grid_spec=pltpu.PrefetchScalarGridSpec(
            num_scalar_prefetch=0,
            grid=(num_blocks,),
            in_specs=[
                pl.BlockSpec((rows, Din), lambda g: (g, 0)),
                # Constant index_map: Pallas dedups the weight re-DMA across grid steps.
                pl.BlockSpec((Din, 3 * dpad), lambda g: (0, 0)),
            ],
            out_specs=pl.BlockSpec((rows, dpad), lambda g: (g, 0)),
        ),
        compiler_params=pltpu.CompilerParams(
            dimension_semantics=("parallel",),
            vmem_limit_bytes=32 * 1024 * 1024,   # fits v5e/v6e/v7x scoped VMEM budgets
        ),
    )(x2d, wqkv)

    if pad_cols:
        out2d = out2d[:, :Dout]
    return out2d.reshape(B, T, Dout)


def _reference(x, wq, wk, wv):
    q = x @ wq
    k = x @ wk
    v = x @ wv
    scores = jnp.einsum("btd,bsd->bts", q, k)
    T = x.shape[1]
    mask = jnp.triu(jnp.ones((T, T), dtype=bool), k=1)
    scores = jnp.where(mask[None, :, :], -jnp.inf, scores)
    w = jax.nn.softmax(scores / jnp.sqrt(jnp.float32(k.shape[-1])), axis=-1)
    return w @ v


if __name__ == "__main__":
    # Shapes implied by the module: din=32, dout=32, context_length=8, batch=2.
    B, T, Din, Dout = 2, 8, 32, 32

    key = jax.random.PRNGKey(0)
    kx, kq, kk, kv = jax.random.split(key, 4)

    x = jax.random.normal(kx, (B, T, Din), dtype=jnp.float32)
    # nn.Linear weights, stored pre-transposed as (Din, Dout) so y = x @ W.
    bound = 1.0 / (Din ** 0.5)
    wq = jax.random.uniform(kq, (Din, Dout), jnp.float32, -bound, bound)
    wk = jax.random.uniform(kk, (Din, Dout), jnp.float32, -bound, bound)
    wv = jax.random.uniform(kv, (Din, Dout), jnp.float32, -bound, bound)

    out = jax.block_until_ready(self_attention(x, wq, wk, wv))

    ref = _reference(x, wq, wk, wv)
    # 2e-3 tolerance accommodates the approximate EUP reciprocal in the softmax
    # denominator (~2^-12 relative error), documented above.
    assert jnp.allclose(out, ref, atol=2e-3, rtol=2e-3), "mismatch vs reference"

    print("KERNEL_OK")
</pallas_src>

<mosaic_0001>
module attributes {stable_mosaic.version = 11 : i64} {
  func.func @_attn_kernel(%arg0: i32, %arg1: memref<8x32xf32, #tpu.memory_space<vmem>>, %arg2: memref<32x384xf32, #tpu.memory_space<vmem>>, %arg3: memref<8x128xf32, #tpu.memory_space<vmem>>) attributes {dimension_semantics = [#tpu.dimension_semantics<parallel>], iteration_bounds = array<i64: 2>, scalar_prefetch = 0 : i64, scratch_operands = 0 : i64, tpu.core_type = #tpu.core_type<tc>, window_params = [{transform_indices = @transform_0, window_bounds = array<i64: 8, 32>}, {pipeline_mode = #tpu.pipeline_mode<synchronous>, transform_indices = @transform_1, window_bounds = array<i64: 32, 384>}, {transform_indices = @transform_2, window_bounds = array<i64: 8, 128>}]} {
    %c0 = arith.constant 0 : index
    %c0_0 = arith.constant 0 : index
    %0 = vector.load %arg1[%c0, %c0_0] : memref<8x32xf32, #tpu.memory_space<vmem>>, vector<8x32xf32>
    %c0_1 = arith.constant 0 : index
    %c0_2 = arith.constant 0 : index
    %1 = vector.load %arg2[%c0_1, %c0_2] : memref<32x384xf32, #tpu.memory_space<vmem>>, vector<32x384xf32>
    %cst = arith.constant dense<0.000000e+00> : vector<8x384xf32>
    %2 = tpu.matmul %0, %1, %cst {dimension_numbers = #tpu.dot_dimension_numbers<[1], [0], [0], [1], [0, 0, 1, 1], [], []>} : vector<8x32xf32>, vector<32x384xf32>, vector<8x384xf32> -> vector<8x384xf32>
    %3 = vector.shape_cast %2 : vector<8x384xf32> to vector<1x8x384xf32>
    %4 = vector.extract_strided_slice %3 {offsets = [0, 0, 0], sizes = [1, 8, 128], strides = [1, 1, 1]} : vector<1x8x384xf32> to vector<1x8x128xf32>
    %5 = vector.extract_strided_slice %3 {offsets = [0, 0, 128], sizes = [1, 8, 128], strides = [1, 1, 1]} : vector<1x8x384xf32> to vector<1x8x128xf32>
    %6 = vector.extract_strided_slice %3 {offsets = [0, 0, 256], sizes = [1, 8, 128], strides = [1, 1, 1]} : vector<1x8x384xf32> to vector<1x8x128xf32>
    "tpu.trace_start"() <{level = 10 : i32, message = "bqd,bkd->bqk"}> : () -> ()
    %cst_3 = arith.constant dense<0.000000e+00> : vector<1x8x8xf32>
    %7 = tpu.matmul %4, %5, %cst_3 {dimension_numbers = #tpu.dot_dimension_numbers<[2], [2], [1], [1], [0, 0, 0, 1, 1, 1], [0], [0]>} : vector<1x8x128xf32>, vector<1x8x128xf32>, vector<1x8x8xf32> -> vector<1x8x8xf32>
    "tpu.trace_stop"() : () -> ()
    %8 = tpu.iota {dimensions = array<i32: 0>} : vector<8x8xi32>
    %9 = tpu.iota {dimensions = array<i32: 1>} : vector<8x8xi32>
    %10 = arith.cmpi sle, %9, %8 : vector<8x8xi32>
    %11 = vector.shape_cast %10 : vector<8x8xi1> to vector<1x8x8xi1>
    %cst_4 = arith.constant -1.000000e+30 : f32
    %12 = vector.broadcast %cst_4 : f32 to vector<1x8x8xf32>
    %13 = arith.select %11, %7, %12 : vector<1x8x8xi1>, vector<1x8x8xf32>
    %cst_5 = arith.constant dense<0xFF800000> : vector<1x8xf32>
    %14 = vector.multi_reduction <maximumf>, %13, %cst_5 [2] : vector<1x8x8xf32> to vector<1x8xf32>
    %15 = vector.shape_cast %14 : vector<1x8xf32> to vector<1x8x1xf32>
    %16 = vector.broadcast %15 : vector<1x8x1xf32> to vector<1x8x8xf32>
    %17 = arith.subf %13, %16 : vector<1x8x8xf32>
    %18 = math.exp %17 : vector<1x8x8xf32>
    %cst_6 = arith.constant dense<0.000000e+00> : vector<1x8xf32>
    %19 = vector.multi_reduction <add>, %18, %cst_6 [2] : vector<1x8x8xf32> to vector<1x8xf32>
    %20 = vector.shape_cast %19 : vector<1x8xf32> to vector<1x8x1xf32>
    %21 = tpu.reciprocal %20 {approx = true} : vector<1x8x1xf32> -> vector<1x8x1xf32>
    %22 = vector.broadcast %21 : vector<1x8x1xf32> to vector<1x8x8xf32>
    %23 = arith.mulf %18, %22 : vector<1x8x8xf32>
    "tpu.trace_start"() <{level = 10 : i32, message = "bqk,bkd->bqd"}> : () -> ()
    %cst_7 = arith.constant dense<0.000000e+00> : vector<1x8x128xf32>
    %24 = tpu.matmul %23, %6, %cst_7 {dimension_numbers = #tpu.dot_dimension_numbers<[2], [1], [1], [2], [0, 0, 0, 1, 1, 2], [0], [0]>} : vector<1x8x8xf32>, vector<1x8x128xf32>, vector<1x8x128xf32> -> vector<1x8x128xf32>
    "tpu.trace_stop"() : () -> ()
    %25 = vector.shape_cast %24 : vector<1x8x128xf32> to vector<8x128xf32>
    %c0_8 = arith.constant 0 : index
    %c0_9 = arith.constant 0 : index
    %26 = vector.load %arg3[%c0_8, %c0_9] : memref<8x128xf32, #tpu.memory_space<vmem>>, vector<8x128xf32>
    tpu.vector_store %arg3[%c0_8, %c0_9], %25 {strides = array<i32>} : memref<8x128xf32, #tpu.memory_space<vmem>>, vector<8x128xf32>,
    return
  }
  func.func @transform_0(%arg0: i32) -> (i32, i32) {
    %c0_i32 = arith.constant 0 : i32
    %c0_i32_0 = arith.constant 0 : i32
    return %arg0, %c0_i32 : i32, i32
  }
  func.func @transform_1(%arg0: i32) -> (i32, i32) {
    %c0_i32 = arith.constant 0 : i32
    %c0_i32_0 = arith.constant 0 : i32
    %c0_i32_1 = arith.constant 0 : i32
    return %c0_i32, %c0_i32_0 : i32, i32
  }
  func.func @transform_2(%arg0: i32) -> (i32, i32) {
    %c0_i32 = arith.constant 0 : i32
    %c0_i32_0 = arith.constant 0 : i32
    return %arg0, %c0_i32 : i32, i32
  }
}

</mosaic_0001>

<bundles_post_ra>
// kernel: tpu_custom_call.1
= control target key start
LH: loop header
LB: loop body
LE: loop exit
PB: predicated region body
PF: predicated region fallthrough
CT: control target
= control target key end

     0   :  { %7 = vsyncpa [#allocation3], 0  ;;  %s1024_s0 = inlined_call_operand.hbm [shape: f32[16,32], index: 0, kind: input, shape index: {}]   ;;  %s1025_s1 = inlined_call_operand.hbm [shape: f32[32,384], index: 1, kind: input, shape index: {}]   ;;  %s1026_s2 = inlined_call_operand.hbm [shape: f32[16,128], index: 2, kind: output, shape index: {}]  }
   0x1   :  { %9 = vsyncpa [#allocation3 + $0x1], 0 }
   0x2   :  { %10 = vsyncpa [#allocation6], 0 }
   0x3   :  { %11 = vsyncpa [#allocation4], 0 }
   0x4   :  { %13 = vsyncpa [#allocation4 + $0x1], 0  ;;  %s846_s9 = smov 0   ;;  %s848_s10 = smov 0  }
   0x5   :  { %s850_s11 = smov 0   ;;  %s852_s12 = smov 0  }
   0x6 LB: > { %s867_s13 = sadd.s32 4294967295, %s822_s12   ;;  %s588_s14 = sadd.s32 4294967294, %s822_s12   ;;  %s822_s12 = sphi %s852_s12, %s1048_s12   ;;  %s818_s11 = sphi %s850_s11, %s1047_s11   ;;  %s814_s10 = sphi %s848_s10, %s1046_s10   ;;  %s810_s9 = sphi %s846_s9, %s1045_s9  }
   0x7   : > { %p39_p0 = scmp.ne.s32.totalorder %s814_s10, %s810_s9  ;;  %p1027_p1 = scmp.eq.s32.totalorder %s867_s13, 0 }
   0x8   : > { %p90_p3 = scmp.eq.s32.totalorder %s588_s14, 1  ;;  %p589_p5 = scmp.ge.s32.totalorder %s822_s12, 1 }
   0x9   : > { %p876_p4 = por %p1027_p1, %p39_p0  ;;  %p97_p7 = scmp.lt.s32.totalorder %s822_s12, 3 }
   0xa   : > { %p881_p6 = por %p90_p3, %p39_p0  ;;  %s824_s18 = smov [#allocation5]  }
   0xb   : > { %s1031_s15 = scalar_select %p876_p4, 1, 0 }
   0xc   : > { %s1032_s16 = scalar_select %p881_p6, 1, 0 }
   0xd   : > { %p886_p8 = pnand %p589_p5, %p97_p7  ;;  %s109_s19 = sshll.u32 %s824_s18, 4  ;;  %s110_s19 = int_to_ptr.vmem [resolvable:$true] %s109_s19 }
   0xe   : > { %s900_s21 = sadd.s32 1, %s822_s12   ;;  %s26_s22 = sadd.s32 1, %s818_s11 }
   0xf   : > { %s1033_s17 = scalar_select %p886_p8, 1, 0 }
  0x10   : > { %p643_p9 = pneg %p886_p8  ;;  %s23_s23 = ssub.s32 %s822_s12, %s900_s21 }
  0x11   : > { %s711_s24 = scalar_lea.vmem %s110_s19, 1536  ;;  %p719_p5 = scmp.lt.s32.totalorder %s110_s19, %s110_s19 }
  0x12   : > { %p895_p11 = pnand %p643_p9, %p1027_p1  ;;  %p712_p13 = scmp.ne.s32.totalorder %s110_s19, %s711_s24 }
  0x13   : > { %p720_p7 = scmp.lt.s32.totalorder %s711_s24, %s711_s24 }
  0x14   : > { %p702_p12 = pneg %p895_p11 }
  0x15   : > { %p721_p10 = por %p720_p7, %p719_p5 }
  0x16   : > { %p714_p0 = pnand %p712_p13, %p702_p12 }
  0x18   : > { %p715_p3 = pneg %p714_p0 }
  0x1a   : > { %p722_p2 = pnand %p721_p10, %p715_p3 }
  0x1c   : > { %725 = shalt.err (!%p722_p2)
}
  0x1d   : > { %s825_s25 = smov 384   ;;  %s826_s26 = smov 24  }
  0x1e   : > { %646 = dma.hbm_to_vmem [thread:$0]  (!%p895_p11), %s1025_s1, 1536, %s110_s19, [#allocation6], %s825_s25, %s825_s25, %s826_s26  }
  0x1f   : > { %p24_p9 = scmp.eq.s32.totalorder %s23_s23, 0  ;;  %p33_p12 = scmp.ne.s32.totalorder %s818_s11, %s814_s10 }
  0x20   : > { %p34_p10 = scmp.eq.s32.totalorder %s822_s12, 0  ;;  %p656_p2 = scmp.lt.s32.totalorder %s822_s12, 2 }
  0x21   : > { %s917_s29 = scalar_select %p24_p9, %s818_s11, %s26_s22  }
  0x22   : > { %p35_p13 = por %p34_p10, %p33_p12  ;;  %p1035_p0 = scmp.eq.s32.totalorder %s867_s13, 1 }
  0x23   : > { %s123_s3 = sand.u32 1, %s818_s11   ;;  %s593_s4 = sshll.u32 %s822_s12, 7 }
  0x24   : > { %p921_p3 = por %p1035_p0, %p33_p12  ;;  %s592_s5 = sshll.u32 %s123_s3, 3 }
  0x25   : > { %s930_s8 = scalar_lea.hbm %s1024_s0, %s593_s4  ;;  %s127_s14 = scalar_lea.vmem [#allocation2], %s592_s5 }
  0x26   : > { %s1036_s30 = scalar_select %p921_p3, 1, 0 }
  0x27   : > { %s134_s18 = sshll.u32 %s127_s14, 4  ;;  %p932_p11 = pnand %p656_p2, %p35_p13  ;;  %s135_s18 = int_to_ptr.vmem [resolvable:$true] %s134_s18 }
  0x28   : > { %s124_s20 = scalar_lea.sflag [#allocation3], %s123_s3  ;;  %s726_s22 = scalar_lea.hbm %s930_s8, 128 }
  0x29   : > { %p727_p5 = scmp.ne.s32.totalorder %s930_s8, %s726_s22  ;;  %p728_p7 = pneg %p932_p11 }
  0x2a   : > { %s731_s25 = scalar_lea.hbm %s1024_s0, 256  ;;  %p732_p10 = scmp.lt.s32.totalorder %s930_s8, %s1024_s0 }
  0x2b   : > { %p729_p9 = pnand %p728_p7, %p727_p5  ;;  %p733_p2 = scmp.lt.s32.totalorder %s731_s25, %s726_s22 }
  0x2d   : > { %p730_p12 = pneg %p729_p9  ;;  %p734_p13 = por %p733_p2, %p732_p10 }
  0x2f   : > { %p735_p0 = pnand %p734_p13, %p730_p12 }
  0x31   : > { %738 = shalt.err (!%p735_p0)
}
  0x32   : > { %s739_s28 = scalar_lea.vmem %s135_s18, 128  ;;  %s827_s3 = smov [#allocation2]  }
  0x33   : > { %p740_p1 = scmp.ne.s32.totalorder %s135_s18, %s739_s28  ;;  %s744_s4 = sshll.u32 %s827_s3, 4  ;;  %s745_s4 = int_to_ptr.vmem [resolvable:$false] %s744_s4 }
  0x34   : > { %s746_s5 = scalar_lea.vmem %s745_s4, 256  ;;  %p747_p5 = scmp.lt.s32.totalorder %s135_s18, %s745_s4 }
  0x35   : > { %p742_p6 = pnand %p740_p1, %p728_p7  ;;  %p748_p9 = scmp.lt.s32.totalorder %s746_s5, %s739_s28 }
  0x37   : > { %p743_p3 = pneg %p742_p6  ;;  %p749_p4 = por %p748_p9, %p747_p5 }
  0x39   : > { %p750_p8 = pnand %p749_p4, %p743_p3 }
  0x3b   : > { %753 = shalt.err (!%p750_p8)
}
  0x3c   : > { %650 = dma.hbm_to_vmem [thread:$0]  (!%p932_p11), %s930_s8, 128, %s135_s18, %s124_s20  }
  0x3d   : > { %p1038_p12 = scmp.ne.s32.totalorder %s1033_s17, 0 }
  0x3e   : > { %s953_s6 = sand.u32 (!%p1038_p12), 1, %s814_s10   ;;  %p1039_p1 = scmp.ne.s32.totalorder (!%p1038_p12), %s1031_s15, 0 }
  0x3f   : > { %143 = sbr.rel (%p1038_p12) target bundleno = 993 (0x3e1), region = 28  ;;  %s595_s7 = sshll.u32 (!%p1038_p12), %s953_s6, 3 }
  0x40   : > { %s146_s14 = scalar_lea.sflag (!%p1038_p12), [#allocation3], %s953_s6  ;;  %s149_s22 = scalar_lea.vmem (!%p1038_p12), [#allocation2], %s595_s7 }
  0x44   : > { %797 = dma.done.wait (%p1039_p1), %s146_s14, 128  }
  0x45   : > { %799 = vsyncadd (%p1039_p1), %s146_s14, 4294967168  ;;  %p1040_p4 = scmp.eq.s32.totalorder %s867_s13, 0 }
  0x47   : > { %801 = dma.done.wait (%p1040_p4), [#allocation6], 1536   ;;  %p1041_p6 = pmov %p1040_p4 }
  0x48   : > { %v828_v0 = vmov 0.0   ;;  %v185_v1 = vld [vmem:[#allocation5 + $0x50] sm:$0xff]  ;;  %v184_v2 = vld [vmem:[#allocation5 + $0x48] sm:$0xff]  ;;  %v182_v3 = vld [vmem:[#allocation5 + $0x38] sm:$0xff]  ;;  %vm187_vm0 = vcmask 261120   ;;  %vm829_vm1 = vmmov 0   ;;  %v402_v16 = vlaneseq }
  0x49   : > { %803 = vsyncadd (%p1041_p6), [#allocation6], 4294965760  ;;  %255 = vmatprep.mubr.f32.mxu0 %v828_v0  ;;  %614 = vmatprep.subr.mxu1 %v828_v0  ;;  %v181_v4 = vld [vmem:[#allocation5 + $0x30] sm:$0xff]  ;;  %v179_v5 = vld [vmem:[#allocation5 + $0x20] sm:$0xff]  ;;  %vm408_vm3 = vcmask 64512   ;;  %s173_s15 = scalar_lea.vmem [#allocation7], %s595_s7 }
  0x4a   : > { %215 = vmatprep.subr.mxu0 %v185_v1  ;;  %v178_v6 = vld [vmem:[#allocation5 + $0x18] sm:$0xff]  ;;  %v176_v7 = vld [vmem:[#allocation5 + $0x8] sm:$0xff]  ;;  %v175_v8 = vld [vmem:[#allocation5] sm:$0xff]  ;;  %622 = vmatprep.mubr.msk.f32.mxu1 %vm829_vm1, %v828_v0  ;;  %v403_v17 = vshrl.u32 %v402_v16, 7  ;;  %v405_v18 = vand.u32 127, %v402_v16  ;;  %s508_s17 = sshll.u32 %s173_s15, 4  ;;  %s978_s17 = int_to_ptr.vmem [resolvable:$true] %s508_s17 }
  0x4b   : > { %216 = vmatpush1.msra.mxu0 %v184_v2  ;;  %v174_v9 = vld [vmem:[%s149_s22] sm:$0xff]  ;;  %v183_v13 = vld [vmem:[#allocation5 + $0x40] sm:$0xff]  ;;  %v180_v14 = vld [vmem:[#allocation5 + $0x28] sm:$0xff]  ;;  %s602_s8 = sshll.u32 %s867_s13, 7  ;;  %s495_s23 = scalar_lea.sflag [#allocation4], %s953_s6 }
  0x4c   : > { %217 = vmatprep.subr.mxu0 %v182_v3  ;;  %v186_v12 = vld [vmem:[#allocation5 + $0x58] sm:$0xff]  ;;  %v177_v15 = vld [vmem:[#allocation5 + $0x10] sm:$0xff]  ;;  %vm406_vm2 = vcmp.le.s32.totalorder %v405_v18, %v403_v17  ;;  %s983_s20 = scalar_lea.hbm %s1026_s2, %s602_s8  ;;  %s754_s24 = scalar_lea.vmem %s978_s17, 128 }
  0x4d   : > { %218 = vmatpush1.msra.mxu0 %v181_v4  ;;  %615 = vmatpush3.msra.mxu1 %v186_v12  ;;  %p755_p8 = scmp.ne.s32.totalorder %s978_s17, %s754_s24  ;;  %p1042_p3 = scmp.ne.s32.totalorder %s1036_s30, 0 }
  0x4e   : > { %219 = vmatprep.subr.mxu0 %v179_v5  ;;  %616 = vmatprep.subr.mxu1 %v828_v0  ;;  %s830_s13 = smov [#allocation7]  }
  0x4f   : > { %220 = vmatpush1.msra.mxu0 %v178_v6  ;;  %617 = vmatpush3.msra.mxu1 %v183_v13  ;;  %p756_p11 = pnand %p755_p8, %p1042_p3  ;;  %s758_s25 = sshll.u32 %s830_s13, 4  ;;  %s759_s25 = int_to_ptr.vmem [resolvable:$false] %s758_s25 }
  0x50   : > { %221 = vmatprep.subr.mxu0 %v176_v7  ;;  %618 = vmatprep.subr.mxu1 %v828_v0  ;;  %s760_s26 = scalar_lea.vmem %s759_s25, 256  ;;  %p761_p10 = scmp.lt.s32.totalorder %s978_s17, %s759_s25 }
  0x51   : > { %222 = vmatpush1.msra.mxu0 %v175_v8  ;;  %619 = vmatpush3.msra.mxu1 %v180_v14  ;;  %p757_p7 = pneg %p756_p11  ;;  %p762_p2 = scmp.lt.s32.totalorder %s760_s26, %s754_s24 }
  0x52   : > { %598 = vmatmul.mubr.msk.f32.vlgmr.msra.gmra.mxu0 %vm187_vm0, %v174_v9  ;;  %625 = vmatprep.subr.mxu0 %v828_v0 }
  0x53   : > { %627 = vmatprep.mubr.msk.f32.mxu0 %vm829_vm1, %v828_v0  ;;  %620 = vmatprep.subr.mxu1 %v828_v0  ;;  %p763_p13 = por %p762_p2, %p761_p10 }
  0x54   : > { %621 = vmatpush3.msra.mxu1 %v177_v15 }
  0x55   : > { %623 = vmatmul.mubr.msk.f32.vlgmr.msra.gmra.mxu1 %vm187_vm0, %v174_v9  ;;  %630 = vmatprep.subr.mxu1 %v828_v0  ;;  %p764_p0 = pnand %p763_p13, %p757_p7 }
  0x56   : > { %632 = vmatprep.mubr.msk.f32.mxu1 %vm829_vm1, %v828_v0 }
 0x112   : > { %v257_v10 = vpop.f32.mrf.mxu0 }
 0x114   : > { %v259_v11 = vpop.f32.mrf.mxu0 }
 0x115   : > { %626 = vmatpush3.xpose.msra.mxu0 %v259_v11  ;;  %v328_v28 = vpop.f32.mrf.mxu1 }
 0x116   : > { %631 = vmatpush3.msra.mxu1 %v328_v28 }
 0x117   : > { %v624_v29 = vpop.f32.mrf.mxu1 }
 0x118   : > { %628 = vmatmul.mubr.f32.vlgmr.msra.gmra.mxu0 %v257_v10 }
 0x1d8   : > { %v398_v19 = vpop.f32.mrf.mxu0 }
 0x1d9   : > { %v407_v20 = vsel %vm406_vm2, %v398_v19, -1e+30 }
 0x1da   : > { %v629_v21 = vpop.f32.mrf.mxu0  ;;  %v409_v22 = vsel %vm408_vm3, %v407_v20, -inf }
 0x1db   : > { %410 = vmax.xlane.f32.xlu0 %v409_v22 }
 0x264   : > { %v411_v23 = vpop.xlane.xlu0 %410 }
 0x265   : > { %v412_v24 = vsub.f32 %v407_v20, %v411_v23 }
 0x267   : > { %v413_v25 = vmul.f32 1.442695, %v412_v24 }
 0x269   : > { %696 = vpow2.f32 %v413_v25 }
 0x276   : > { %v697_v26 = vpop.eup %696 }
 0x277   : > { %v415_v27 = vsel %vm408_vm3, %v697_v26, 0.0 }
 0x278   : > { %416 = vadd.xlane.f32.xlu0 %v415_v27 }
 0x301   : > { %v417_v30 = vpop.xlane.xlu0 %416 }
 0x302   : > { %698 = vrcp.f32 %v417_v30 }
 0x30f   : > { %v699_v31 = vpop.eup %698 }
 0x310   : > { %v419_v32 = vmul.f32 %v699_v31, %v697_v26 }
 0x312   : > { %633 = vmatmul.mubr.msk.f32.vlgmr.msra.gmra.mxu1 %vm408_vm3, %v419_v32 }
 0x3d2   : > { %v489_v33 = vpop.f32.mrf.mxu1 }
 0x3d3   : > { %493 = vst [vmem:[%s173_s15] sm:$0xff] %v489_v33 }
 0x3d4   : > { %v634_v34 = vpop.f32.mrf.mxu1 }
 0x3d5   : > { %767 = shalt.err (!%p764_p0)
}
 0x3d6   : > { %s768_s27 = scalar_lea.hbm %s983_s20, 128  ;;  %s772_s4 = scalar_lea.hbm %s1026_s2, 256 }
 0x3d7   : > { %p769_p5 = scmp.ne.s32.totalorder %s983_s20, %s768_s27  ;;  %p773_p1 = scmp.lt.s32.totalorder %s983_s20, %s1026_s2 }
 0x3d8   : > { %p774_p4 = scmp.lt.s32.totalorder %s772_s4, %s768_s27 }
 0x3d9   : > { %p770_p9 = pnand %p769_p5, %p1042_p3 }
 0x3da   : > { %p775_p6 = por %p774_p4, %p773_p1 }
 0x3db   : > { %p771_p12 = pneg %p770_p9 }
 0x3dd   : > { %p776_p8 = pnand %p775_p6, %p771_p12 }
 0x3df   : > { %779 = shalt.err (!%p776_p8)
}
 0x3e0   : > { %641 = dma.vmem_to_hbm [thread:$0]  (%p1042_p3), %s978_s17, 128, %s983_s20, %s495_s23  }
 0x3e1 PF: > { %s520_s7 = sand.u32 1, %s810_s9   ;;  %p1043_p11 = scmp.ne.s32.totalorder %s1032_s16, 0 }
 0x3e2   : > { %p1044_p7 = scmp.ge.s32.totalorder %s822_s12, 2  ;;  %s521_s14 = scalar_lea.sflag [#allocation4], %s520_s7 }
 0x3e4   : > { %p652_p10 = pnand %p1044_p7, %p1043_p11 }
 0x3e6   : > { %p653_p2 = pneg %p652_p10 }
 0x3e8   : > { %805 = dma.done.wait (%p653_p2), %s521_s14, 128  }
 0x3e9   : > { %807 = vsyncadd (%p653_p2), %s521_s14, 4294967168  ;;  %p16_p13 = scmp.ge.s32.totalorder %s900_s21, 4   ;;  %s1045_s9 = smov %s814_s10 }
 0x3ea   : > { %s1046_s10 = smov %s818_s11  ;;  %s1047_s11 = smov %s917_s29 }
 0x3eb   : > { %s1048_s12 = smov %s900_s21  ;;  %18 = sbr.rel (!%p16_p13) target bundleno = 6 (0x6), region = 77 }
 0x3f0   :  { %526 = vsyncpa [#allocation3], 1 }
 0x3f1   :  { %528 = vsyncpa [#allocation3 + $0x1], 1 }
 0x3f2   :  { %529 = vsyncpa [#allocation6], 1 }
 0x3f3   :  { %530 = vsyncpa [#allocation4], 1 }
 0x3f4   :  { %532 = vsyncpa [#allocation4 + $0x1], 1 }

</bundles_post_ra>
